<compile_context>
chip_gen: v6e
topology: v6e:2x2x1
jax: 0.10.0
libtpu: 0.0.40
codegen_flags: <defaults>
</compile_context>

<pallas_src>
import functools

import jax
import jax.numpy as jnp
from jax.experimental import pallas as pl
from jax.experimental.pallas import tpu as pltpu

H1 = 256          # hidden-1 width (already lane aligned)
H2 = 64           # hidden-2 width in the PyTorch module
H2_PAD = 128      # padded hidden-2 width (zero cols in w2/b2, zero rows in w3)
NEG_INF = -1e30   # bias for padded output lanes -> exp underflows to exactly 0


def _round_up(x, m):
    return (x + m - 1) // m * m


def _choose_block(batch, block_b):
    """Batch tile: cap at block_b, target >=4 grid steps (v7x megacore + pipeline),
    keep the sublane dim a multiple of 8."""
    target = _round_up(max(1, -(-batch // 4)), 8)
    return max(8, min(block_b, target))


def prepare_params(w1, b1, w2, b2, w3, b3):
    """One-time parameter prep: pad hidden2/out dims to 128 lanes, cast MXU
    operands (weights) to bf16, keep biases f32. Call once, reuse every step."""
    out_dim = w3.shape[1]
    out_pad = _round_up(out_dim, 128)

    w1_p = w1.astype(jnp.bfloat16)                                   # (in, 256)
    b1_p = b1.astype(jnp.float32)                                    # (1, 256)
    w2_p = jnp.pad(w2, ((0, 0), (0, H2_PAD - H2))).astype(jnp.bfloat16)   # (256, 128)
    b2_p = jnp.pad(b2, ((0, 0), (0, H2_PAD - H2))).astype(jnp.float32)    # (1, 128)
    w3_p = jnp.pad(w3, ((0, H2_PAD - H2), (0, out_pad - out_dim))
                   ).astype(jnp.bfloat16)                            # (128, out_pad)
    b3_p = jnp.pad(b3, ((0, 0), (0, out_pad - out_dim)),
                   constant_values=NEG_INF).astype(jnp.float32)      # (1, out_pad)
    return w1_p, b1_p, w2_p, b2_p, w3_p, b3_p


def mlp_softmax_kernel(x_ref, w1_ref, b1_ref, w2_ref, b2_ref, w3_ref, b3_ref,
                       o_ref):
    """Fused 3-layer MLP + softmax for one batch tile (everything VMEM-resident)."""
    # x arrives as unpadded f32; cast to bf16 only for the MXU operand.
    x = x_ref[...].astype(jnp.bfloat16)

    # Layer 1: Linear(in, 256) + ReLU  (bf16 MXU operands, f32 accumulation)
    h1 = jnp.dot(x, w1_ref[...], preferred_element_type=jnp.float32)
    h1 = jnp.maximum(h1 + b1_ref[...], 0.0)

    # Layer 2: Linear(256, 128-padded) + ReLU
    h2 = jnp.dot(h1.astype(w2_ref.dtype), w2_ref[...],
                 preferred_element_type=jnp.float32)
    h2 = jnp.maximum(h2 + b2_ref[...], 0.0)

    # Layer 3: Linear(128-padded, 128-padded) + softmax over the last axis.
    # Padded logit lanes carry a -1e30 bias -> exp() == 0 -> softmax matches
    # the unpadded 36-way softmax exactly. Padded batch rows (if any) see
    # bias-only logits: harmless, finite, and sliced off by the wrapper.
    logits = jnp.dot(h2.astype(w3_ref.dtype), w3_ref[...],
                     preferred_element_type=jnp.float32) + b3_ref[...]
    m = jnp.max(logits, axis=-1, keepdims=True)
    e = jnp.exp(logits - m)
    denom = jnp.sum(e, axis=-1, keepdims=True)
    o_ref[...] = (e / denom).astype(o_ref.dtype)   # exact normalization


@functools.partial(jax.jit, static_argnames=("block_b",))
def mlp_forward(x, w1_p, b1_p, w2_p, b2_p, w3_p, b3_p, *, block_b=1024):
    """x: (B, in_dim) f32 (already flattened); params from prepare_params().
    Returns (B, out_dim_padded) f32 softmax; caller slices to out_dim."""
    B, in_dim = x.shape
    out_pad = w3_p.shape[1]

    # ---- batch tiling (x stays f32 + unpadded along features) --------------
    blk = _choose_block(B, block_b)
    b_pad = _round_up(B, blk)
    x_p = jnp.pad(x, ((0, b_pad - B), (0, 0)))   # batch-only pad (zero rows)

    resident = lambda shape: pl.BlockSpec(shape, lambda i: (0, 0))

    out_padded = pl.pallas_call(
        mlp_softmax_kernel,
        out_shape=jax.ShapeDtypeStruct((b_pad, out_pad), jnp.float32),
        grid_spec=pltpu.PrefetchScalarGridSpec(
            num_scalar_prefetch=0,
            grid=(b_pad // blk,),
            in_specs=[
                # x batch tile: last dim == full array dim (64), sublane blk%8==0
                pl.BlockSpec((blk, in_dim), lambda i: (i, 0)),
                resident((in_dim, H1)),        # w1 (VMEM-resident, bf16)
                resident((1, H1)),             # b1 (f32)
                resident((H1, H2_PAD)),        # w2
                resident((1, H2_PAD)),         # b2
                resident((H2_PAD, out_pad)),   # w3
                resident((1, out_pad)),        # b3 (-1e30 in padded lanes)
            ],
            out_specs=pl.BlockSpec((blk, out_pad), lambda i: (i, 0)),
        ),
        compiler_params=pltpu.CompilerParams(
            dimension_semantics=("parallel",)),
    )(x_p, w1_p, b1_p, w2_p, b2_p, w3_p, b3_p)

    return out_padded[:B]


def nn_forward(x, params, out_dim, *, block_b=1024):
    """Full module forward: flatten -> fused MLP+softmax -> slice to out_dim."""
    B = x.shape[0]
    x2d = x.reshape(B, -1).astype(jnp.float32)   # x.view(batch_size, -1)
    y_pad = mlp_forward(x2d, *params, block_b=block_b)
    return y_pad[:, :out_dim]


def init_linear(key, fan_in, fan_out):
    # PyTorch nn.Linear default init: U(-1/sqrt(fan_in), 1/sqrt(fan_in)).
    kw, kb = jax.random.split(key)
    bound = 1.0 / jnp.sqrt(jnp.float32(fan_in))
    w = jax.random.uniform(kw, (fan_in, fan_out), jnp.float32, -bound, bound)
    b = jax.random.uniform(kb, (1, fan_out), jnp.float32, -bound, bound)
    return w, b


if __name__ == "__main__":
    # Shapes consistent with the module: batch = 64 (as in the training script),
    # in_dim = flattened feature dim (64), out_dim = 36.
    B, in_dim, out_dim = 64, 64, 36

    key = jax.random.PRNGKey(0)
    kx, k1, k2, k3 = jax.random.split(key, 4)

    x = jax.random.normal(kx, (B, in_dim), jnp.float32)
    w1, b1 = init_linear(k1, in_dim, H1)
    w2, b2 = init_linear(k2, H1, H2)
    w3, b3 = init_linear(k3, H2, out_dim)

    # One-time parameter prep (padding + bf16 cast), reused across calls.
    params = prepare_params(w1, b1, w2, b2, w3, b3)

    y = nn_forward(x, params, out_dim)
    y = jax.block_until_ready(y)

    # Pure-JAX f32 reference (tolerance reflects bf16 MXU operands).
    def ref(x):
        a = jnp.maximum(x @ w1 + b1, 0.0)
        a = jnp.maximum(a @ w2 + b2, 0.0)
        return jax.nn.softmax(a @ w3 + b3, axis=-1)

    y_ref = ref(x)
    assert y.shape == (B, out_dim)
    assert jnp.allclose(y, y_ref, atol=2e-2, rtol=2e-2)
    assert jnp.allclose(jnp.sum(y, axis=-1), 1.0, atol=1e-3)

    print("KERNEL_OK")
</pallas_src>

<mosaic_0001>
module attributes {stable_mosaic.version = 11 : i64} {
  func.func @mlp_softmax_kernel(%arg0: i32, %arg1: memref<16x64xf32, #tpu.memory_space<vmem>>, %arg2: memref<64x256xbf16, #tpu.memory_space<vmem>>, %arg3: memref<1x256xf32, #tpu.memory_space<vmem>>, %arg4: memref<256x128xbf16, #tpu.memory_space<vmem>>, %arg5: memref<1x128xf32, #tpu.memory_space<vmem>>, %arg6: memref<128x128xbf16, #tpu.memory_space<vmem>>, %arg7: memref<1x128xf32, #tpu.memory_space<vmem>>, %arg8: memref<16x128xf32, #tpu.memory_space<vmem>>) attributes {dimension_semantics = [#tpu.dimension_semantics<parallel>], iteration_bounds = array<i64: 4>, scalar_prefetch = 0 : i64, scratch_operands = 0 : i64, tpu.core_type = #tpu.core_type<tc>, window_params = [{transform_indices = @transform_0, window_bounds = array<i64: 16, 64>}, {pipeline_mode = #tpu.pipeline_mode<synchronous>, transform_indices = @transform_1, window_bounds = array<i64: 64, 256>}, {pipeline_mode = #tpu.pipeline_mode<synchronous>, transform_indices = @transform_2, window_bounds = array<i64: 1, 256>}, {pipeline_mode = #tpu.pipeline_mode<synchronous>, transform_indices = @transform_3, window_bounds = array<i64: 256, 128>}, {pipeline_mode = #tpu.pipeline_mode<synchronous>, transform_indices = @transform_4, window_bounds = array<i64: 1, 128>}, {pipeline_mode = #tpu.pipeline_mode<synchronous>, transform_indices = @transform_5, window_bounds = array<i64: 128, 128>}, {pipeline_mode = #tpu.pipeline_mode<synchronous>, transform_indices = @transform_6, window_bounds = array<i64: 1, 128>}, {transform_indices = @transform_7, window_bounds = array<i64: 16, 128>}]} {
    %c0 = arith.constant 0 : index
    %c0_0 = arith.constant 0 : index
    %0 = vector.load %arg1[%c0, %c0_0] : memref<16x64xf32, #tpu.memory_space<vmem>>, vector<16x64xf32>
    %1 = arith.truncf %0 : vector<16x64xf32> to vector<16x64xbf16>
    %c0_1 = arith.constant 0 : index
    %c0_2 = arith.constant 0 : index
    %2 = vector.load %arg2[%c0_1, %c0_2] : memref<64x256xbf16, #tpu.memory_space<vmem>>, vector<64x256xbf16>
    %cst = arith.constant dense<0.000000e+00> : vector<16x256xf32>
    %3 = tpu.matmul %1, %2, %cst {dimension_numbers = #tpu.dot_dimension_numbers<[1], [0], [0], [1], [0, 0, 1, 1], [], []>} : vector<16x64xbf16>, vector<64x256xbf16>, vector<16x256xf32> -> vector<16x256xf32>
    %c0_3 = arith.constant 0 : index
    %c0_4 = arith.constant 0 : index
    %4 = vector.load %arg3[%c0_3, %c0_4] : memref<1x256xf32, #tpu.memory_space<vmem>>, vector<1x256xf32>
    %5 = vector.broadcast %4 : vector<1x256xf32> to vector<16x256xf32>
    %6 = arith.addf %3, %5 : vector<16x256xf32>
    %cst_5 = arith.constant 0.000000e+00 : f32
    %7 = vector.broadcast %cst_5 : f32 to vector<16x256xf32>
    %8 = arith.maximumf %6, %7 : vector<16x256xf32>
    %9 = arith.truncf %8 : vector<16x256xf32> to vector<16x256xbf16>
    %c0_6 = arith.constant 0 : index
    %c0_7 = arith.constant 0 : index
    %10 = vector.load %arg4[%c0_6, %c0_7] : memref<256x128xbf16, #tpu.memory_space<vmem>>, vector<256x128xbf16>
    %cst_8 = arith.constant dense<0.000000e+00> : vector<16x128xf32>
    %11 = tpu.matmul %9, %10, %cst_8 {dimension_numbers = #tpu.dot_dimension_numbers<[1], [0], [0], [1], [0, 0, 1, 1], [], []>} : vector<16x256xbf16>, vector<256x128xbf16>, vector<16x128xf32> -> vector<16x128xf32>
    %c0_9 = arith.constant 0 : index
    %c0_10 = arith.constant 0 : index
    %12 = vector.load %arg5[%c0_9, %c0_10] : memref<1x128xf32, #tpu.memory_space<vmem>>, vector<1x128xf32>
    %13 = vector.broadcast %12 : vector<1x128xf32> to vector<16x128xf32>
    %14 = arith.addf %11, %13 : vector<16x128xf32>
    %cst_11 = arith.constant 0.000000e+00 : f32
    %15 = vector.broadcast %cst_11 : f32 to vector<16x128xf32>
    %16 = arith.maximumf %14, %15 : vector<16x128xf32>
    %17 = arith.truncf %16 : vector<16x128xf32> to vector<16x128xbf16>
    %c0_12 = arith.constant 0 : index
    %c0_13 = arith.constant 0 : index
    %18 = vector.load %arg6[%c0_12, %c0_13] : memref<128x128xbf16, #tpu.memory_space<vmem>>, vector<128x128xbf16>
    %cst_14 = arith.constant dense<0.000000e+00> : vector<16x128xf32>
    %19 = tpu.matmul %17, %18, %cst_14 {dimension_numbers = #tpu.dot_dimension_numbers<[1], [0], [0], [1], [0, 0, 1, 1], [], []>} : vector<16x128xbf16>, vector<128x128xbf16>, vector<16x128xf32> -> vector<16x128xf32>
    %c0_15 = arith.constant 0 : index
    %c0_16 = arith.constant 0 : index
    %20 = vector.load %arg7[%c0_15, %c0_16] : memref<1x128xf32, #tpu.memory_space<vmem>>, vector<1x128xf32>
    %21 = vector.broadcast %20 : vector<1x128xf32> to vector<16x128xf32>
    %22 = arith.addf %19, %21 : vector<16x128xf32>
    %cst_17 = arith.constant dense<0xFF800000> : vector<16xf32>
    %23 = vector.multi_reduction <maximumf>, %22, %cst_17 [1] : vector<16x128xf32> to vector<16xf32>
    %24 = vector.shape_cast %23 : vector<16xf32> to vector<16x1xf32>
    %25 = vector.broadcast %24 : vector<16x1xf32> to vector<16x128xf32>
    %26 = arith.subf %22, %25 : vector<16x128xf32>
    %27 = math.exp %26 : vector<16x128xf32>
    %cst_18 = arith.constant dense<0.000000e+00> : vector<16xf32>
    %28 = vector.multi_reduction <add>, %27, %cst_18 [1] : vector<16x128xf32> to vector<16xf32>
    %29 = vector.shape_cast %28 : vector<16xf32> to vector<16x1xf32>
    %30 = vector.broadcast %29 : vector<16x1xf32> to vector<16x128xf32>
    %31 = arith.divf %27, %30 : vector<16x128xf32>
    %c0_19 = arith.constant 0 : index
    %c0_20 = arith.constant 0 : index
    %32 = vector.load %arg8[%c0_19, %c0_20] : memref<16x128xf32, #tpu.memory_space<vmem>>, vector<16x128xf32>
    tpu.vector_store %arg8[%c0_19, %c0_20], %31 {strides = array<i32>} : memref<16x128xf32, #tpu.memory_space<vmem>>, vector<16x128xf32>,
    return
  }
  func.func @transform_0(%arg0: i32) -> (i32, i32) {
    %c0_i32 = arith.constant 0 : i32
    %c0_i32_0 = arith.constant 0 : i32
    return %arg0, %c0_i32 : i32, i32
  }
  func.func @transform_1(%arg0: i32) -> (i32, i32) {
    %c0_i32 = arith.constant 0 : i32
    %c0_i32_0 = arith.constant 0 : i32
    %c0_i32_1 = arith.constant 0 : i32
    return %c0_i32, %c0_i32_0 : i32, i32
  }
  func.func @transform_2(%arg0: i32) -> (i32, i32) {
    %c0_i32 = arith.constant 0 : i32
    %c0_i32_0 = arith.constant 0 : i32
    %c0_i32_1 = arith.constant 0 : i32
    return %c0_i32, %c0_i32_0 : i32, i32
  }
  func.func @transform_3(%arg0: i32) -> (i32, i32) {
    %c0_i32 = arith.constant 0 : i32
    %c0_i32_0 = arith.constant 0 : i32
    %c0_i32_1 = arith.constant 0 : i32
    return %c0_i32, %c0_i32_0 : i32, i32
  }
  func.func @transform_4(%arg0: i32) -> (i32, i32) {
    %c0_i32 = arith.constant 0 : i32
    %c0_i32_0 = arith.constant 0 : i32
    %c0_i32_1 = arith.constant 0 : i32
    return %c0_i32, %c0_i32_0 : i32, i32
  }
  func.func @transform_5(%arg0: i32) -> (i32, i32) {
    %c0_i32 = arith.constant 0 : i32
    %c0_i32_0 = arith.constant 0 : i32
    %c0_i32_1 = arith.constant 0 : i32
    return %c0_i32, %c0_i32_0 : i32, i32
  }
  func.func @transform_6(%arg0: i32) -> (i32, i32) {
    %c0_i32 = arith.constant 0 : i32
    %c0_i32_0 = arith.constant 0 : i32
    %c0_i32_1 = arith.constant 0 : i32
    return %c0_i32, %c0_i32_0 : i32, i32
  }
  func.func @transform_7(%arg0: i32) -> (i32, i32) {
    %c0_i32 = arith.constant 0 : i32
    %c0_i32_0 = arith.constant 0 : i32
    return %arg0, %c0_i32 : i32, i32
  }
}

</mosaic_0001>

<bundles_post_ra>
// kernel: mlp_forward.1
= control target key start
LH: loop header
LB: loop body
LE: loop exit
PB: predicated region body
PF: predicated region fallthrough
CT: control target
= control target key end

     0   :  { %s1580_s0 = inlined_call_operand.hbm [shape: f32[64,64], index: 0, kind: input, shape index: {}]   ;;  %s1581_s1 = inlined_call_operand.hbm [shape: bf16[64,256], index: 1, kind: input, shape index: {}]   ;;  %s1582_s2 = inlined_call_operand.vmem [shape: f32[1,256], index: 2, kind: input, shape index: {}]   ;;  %s1583_s3 = inlined_call_operand.hbm [shape: bf16[256,128], index: 3, kind: input, shape index: {}]   ;;  %s1584_s4 = inlined_call_operand.vmem [shape: f32[1,128], index: 4, kind: input, shape index: {}]   ;;  %s1585_s5 = inlined_call_operand.hbm [shape: bf16[128,128], index: 5, kind: input, shape index: {}]   ;;  %s1586_s6 = inlined_call_operand.vmem [shape: f32[1,128], index: 6, kind: input, shape index: {}]   ;;  %s1587_s7 = inlined_call_operand.hbm [shape: f32[64,128], index: 7, kind: output, shape index: {}]  }
   0x1   :  { %1594 = sst [smem:[#allocation15_spill]] %s1581_s1 }
   0x2   :  { %12 = vsyncpa [#allocation3], 0 }
   0x3   :  { %14 = vsyncpa [#allocation3 + $0x1], 0 }
   0x4   :  { %15 = vsyncpa [#allocation6], 0 }
   0x5   :  { %16 = vsyncpa [#allocation9], 0 }
   0x6   :  { %17 = vsyncpa [#allocation4], 0 }
   0x7   :  { %19 = vsyncpa [#allocation4 + $0x1], 0  ;;  %s1359_s24 = smov 0   ;;  %s1361_s25 = smov 0  }
   0x8   :  { %s1363_s26 = smov 0   ;;  %s1365_s27 = smov 0  }
   0x9 LB: > { %s1380_s28 = sadd.s32 4294967295, %s1303_s27   ;;  %s887_s29 = sadd.s32 4294967294, %s1303_s27   ;;  %s1303_s27 = sphi %s1365_s27, %s1615_s27   ;;  %s1299_s26 = sphi %s1363_s26, %s1614_s26   ;;  %s1295_s25 = sphi %s1361_s25, %s1613_s25   ;;  %s1291_s24 = sphi %s1359_s24, %s1612_s24  }
   0xa   : > { %p45_p0 = scmp.ne.s32.totalorder %s1295_s25, %s1291_s24  ;;  %p1589_p1 = scmp.eq.s32.totalorder %s1380_s28, 0 }
   0xb   : > { %p195_p2 = scmp.eq.s32.totalorder %s1380_s28, 3  ;;  %p201_p3 = scmp.eq.s32.totalorder %s887_s29, 3 }
   0xc   : > { %p1389_p4 = por %p1589_p1, %p45_p0  ;;  %p888_p5 = scmp.ge.s32.totalorder %s1303_s27, 1 }
   0xd   : > { %p1394_p6 = por %p201_p3, %p45_p0  ;;  %p208_p7 = scmp.lt.s32.totalorder %s1303_s27, 5 }
   0xe   : > { %s1595_s30 = scalar_select %p1389_p4, 1, 0 }
   0xf   : > { %s1596_s8 = scalar_select %p1394_p6, 1, 0 }
  0x10   : > { %p1399_p8 = pnand %p888_p5, %p208_p7  ;;  %s1305_s10 = smov [#allocation5]  }
  0x11   : > { %s220_s11 = sshll.u32 %s1305_s10, 4  ;;  %s1306_s13 = smov [#allocation7]   ;;  %s221_s11 = int_to_ptr.vmem [resolvable:$true] %s220_s11 }
  0x12   : > { %s1597_s9 = scalar_select %p1399_p8, 1, 0 }
  0x13   : > { %p1011_p9 = pneg %p1399_p8  ;;  %s236_s14 = sshll.u32 %s1306_s13, 4  ;;  %s237_s14 = int_to_ptr.vmem [resolvable:$true] %s236_s14 }
  0x14   : > { %s1136_s15 = scalar_lea.vmem %s221_s11, 1024  ;;  %p1144_p3 = scmp.lt.s32.totalorder %s221_s11, %s221_s11 }
  0x15   : > { %p1407_p10 = pnand %p1011_p9, %p1589_p1  ;;  %p1137_p12 = scmp.ne.s32.totalorder %s221_s11, %s1136_s15 }
  0x16   : > { %p1145_p5 = scmp.lt.s32.totalorder %s1136_s15, %s1136_s15 }
  0x17   : > { %p1127_p11 = pneg %p1407_p10 }
  0x18   : > { %p1146_p7 = por %p1145_p5, %p1144_p3 }
  0x19   : > { %p1139_p13 = pnand %p1137_p12, %p1127_p11 }
  0x1b   : > { %p1140_p0 = pneg %p1139_p13 }
  0x1d   : > { %p1147_p9 = pnand %p1146_p7, %p1140_p0 }
  0x1f   : > { %1150 = shalt.err (!%p1147_p9)
}
  0x20   : > { %s1588_s16 = smov 128   ;;  %s1590_s17 = smov 8  }
  0x21   : > { %s1599_s1 = sld [smem:[#allocation15_spill]]  ;;  %s1162_s20 = scalar_lea.vmem %s237_s14, 2048 }
  0x22   : > { %p1163_p12 = scmp.ne.s32.totalorder %s237_s14, %s1162_s20  ;;  %p1170_p0 = scmp.lt.s32.totalorder %s237_s14, %s237_s14 }
  0x23   : > { %p1171_p5 = scmp.lt.s32.totalorder %s1162_s20, %s1162_s20 }
  0x24   : > { %p1165_p13 = pnand %p1163_p12, %p1127_p11 }
  0x25   : > { %p1172_p7 = por %p1171_p5, %p1170_p0 }
  0x26   : > { %p1166_p3 = pneg %p1165_p13 }
  0x27   : > { %1014 = dma.hbm_to_vmem [thread:$0]  (!%p1407_p10), %s1599_s1, 1024, %s221_s11, [#allocation6], %s1588_s16, %s1588_s16, %s1590_s17  }
  0x28   : > { %p1173_p9 = pnand %p1172_p7, %p1166_p3 }
  0x2a   : > { %1176 = shalt.err (!%p1173_p9)
}
  0x2b   : > { %s1309_s21 = smov 64   ;;  %s1310_s22 = smov 4  }
  0x2c   : > { %1017 = dma.hbm_to_vmem [thread:$0]  (!%p1407_p10), %s1583_s3, 2048, %s237_s14, [#allocation6], %s1309_s21, %s1309_s21, %s1310_s22  }
  0x2d   : > { %s1311_s10 = smov [#allocation8]   ;;  %s1433_s13 = sadd.s32 1, %s1303_s27  }
  0x2e   : > { %s252_s11 = sshll.u32 %s1311_s10, 4  ;;  %s253_s11 = int_to_ptr.vmem [resolvable:$true] %s252_s11 }
  0x2f   : > { %s1188_s15 = scalar_lea.vmem %s253_s11, 1024  ;;  %p1196_p0 = scmp.lt.s32.totalorder %s253_s11, %s253_s11 }
  0x30   : > { %p1189_p12 = scmp.ne.s32.totalorder %s253_s11, %s1188_s15  ;;  %p1197_p5 = scmp.lt.s32.totalorder %s1188_s15, %s1188_s15 }
  0x32   : > { %p1191_p13 = pnand %p1189_p12, %p1127_p11  ;;  %p1198_p7 = por %p1197_p5, %p1196_p0 }
  0x34   : > { %p1192_p3 = pneg %p1191_p13 }
  0x36   : > { %p1199_p9 = pnand %p1198_p7, %p1192_p3 }
  0x38   : > { %1202 = shalt.err (!%p1199_p9)
}
  0x39   : > { %1020 = dma.hbm_to_vmem [thread:$0]  (!%p1407_p10), %s1585_s5, 1024, %s253_s11, [#allocation9], %s1309_s21, %s1309_s21, %s1310_s22  }
  0x3a   : > { %s29_s19 = ssub.s32 %s1303_s27, %s1433_s13  ;;  %s32_s20 = sadd.s32 1, %s1299_s26 }
  0x3b   : > { %p30_p11 = scmp.eq.s32.totalorder %s29_s19, 0  ;;  %p39_p12 = scmp.ne.s32.totalorder %s1299_s26, %s1295_s25 }
  0x3c   : > { %p40_p13 = scmp.eq.s32.totalorder %s1303_s27, 0  ;;  %p1032_p3 = scmp.lt.s32.totalorder %s1303_s27, 4 }
  0x3d   : > { %s1451_s12 = scalar_select %p30_p11, %s1299_s26, %s32_s20  }
  0x3e   : > { %p41_p0 = por %p40_p13, %p39_p12  ;;  %p1455_p5 = por %p195_p2, %p39_p12 }
  0x3f   : > { %s269_s29 = sand.u32 1, %s1299_s26   ;;  %s942_s10 = sshll.u32 %s1303_s27, 8 }
  0x40   : > { %s1600_s23 = scalar_select %p1455_p5, 1, 0 }
  0x41   : > { %s893_s15 = sshll.u32 %s269_s29, 4  ;;  %s1464_s21 = scalar_lea.hbm %s1580_s0, %s942_s10 }
  0x42   : > { %s273_s22 = scalar_lea.vmem [#allocation2], %s893_s15  ;;  %p1466_p10 = pnand %p1032_p3, %p41_p0 }
  0x43   : > { %s280_s11 = sshll.u32 %s273_s22, 4  ;;  %s1472_s20 = scalar_lea.sflag [#allocation3], %s269_s29  ;;  %s1470_s11 = int_to_ptr.vmem [resolvable:$true] %s280_s11 }
  0x44   : > { %s1203_s16 = scalar_lea.hbm %s1464_s21, 256  ;;  %p1205_p7 = pneg %p1466_p10 }
  0x45   : > { %p1204_p2 = scmp.ne.s32.totalorder %s1464_s21, %s1203_s16  ;;  %s1208_s15 = scalar_lea.hbm %s1580_s0, 1024 }
  0x46   : > { %p1209_p12 = scmp.lt.s32.totalorder %s1464_s21, %s1580_s0  ;;  %p1210_p13 = scmp.lt.s32.totalorder %s1208_s15, %s1203_s16 }
  0x47   : > { %p1206_p9 = pnand %p1205_p7, %p1204_p2 }
  0x48   : > { %p1211_p3 = por %p1210_p13, %p1209_p12 }
  0x49   : > { %p1207_p11 = pneg %p1206_p9 }
  0x4b   : > { %p1212_p0 = pnand %p1211_p3, %p1207_p11 }
  0x4d   : > { %1215 = shalt.err (!%p1212_p0)
}
  0x4e   : > { %s1216_s29 = scalar_lea.vmem %s1470_s11, 256  ;;  %s1312_s17 = smov [#allocation2]  }
  0x4f   : > { %p1217_p1 = scmp.ne.s32.totalorder %s1470_s11, %s1216_s29  ;;  %s1221_s1 = sshll.u32 %s1312_s17, 4  ;;  %s1222_s1 = int_to_ptr.vmem [resolvable:$false] %s1221_s1 }
  0x50   : > { %s1223_s10 = scalar_lea.vmem %s1222_s1, 512  ;;  %p1224_p9 = scmp.lt.s32.totalorder %s1470_s11, %s1222_s1 }
  0x51   : > { %p1219_p6 = pnand %p1217_p1, %p1205_p7  ;;  %p1225_p5 = scmp.lt.s32.totalorder %s1223_s10, %s1216_s29 }
  0x53   : > { %p1220_p2 = pneg %p1219_p6  ;;  %p1226_p4 = por %p1225_p5, %p1224_p9 }
  0x55   : > { %p1227_p8 = pnand %p1226_p4, %p1220_p2 }
  0x57   : > { %1230 = shalt.err (!%p1227_p8)
}
  0x58   : > { %s1602_s16 = smov 8   ;;  %s1603_s18 = smov 128  }
  0x59   : > { %1024 = dma.hbm_to_vmem [thread:$0]  (!%p1466_p10), %s1464_s21, 256, %s1470_s11, %s1472_s20, %s1603_s18, %s1603_s18, %s1602_s16  }
  0x5a   : > { %p1604_p1 = scmp.ne.s32.totalorder %s1597_s9, 0 }
  0x5b   : > { %s1499_s17 = sand.u32 (!%p1604_p1), 1, %s1295_s25   ;;  %p1605_p4 = scmp.ne.s32.totalorder (!%p1604_p1), %s1595_s30, 0 }
  0x5c   : > { %292 = sbr.rel (%p1604_p1) target bundleno = 1057 (0x421), region = 48  ;;  %s897_s1 = sshll.u32 (!%p1604_p1), %s1499_s17, 4 }
  0x5d   : > { %s295_s15 = scalar_lea.sflag (!%p1604_p1), [#allocation3], %s1499_s17  ;;  %s1505_s19 = scalar_lea.vmem (!%p1604_p1), [#allocation2], %s897_s1 }
  0x61   : > { %1274 = dma.done.wait (%p1605_p4), %s295_s15, 256  }
  0x62   : > { %1276 = vsyncadd (%p1605_p4), %s295_s15, 4294967040  ;;  %p1606_p6 = scmp.eq.s32.totalorder %s1380_s28, 0 }
  0x64   : > { %1278 = dma.done.wait (%p1606_p6), [#allocation6], 3072   ;;  %p1607_p8 = pmov %p1606_p6 }
  0x65   : > { %p1608_p5 = pmov %p1606_p6 }
  0x66   : > { %1280 = vsyncadd (%p1607_p8), [#allocation6], 4294964224 }
  0x67   : > { %1282 = dma.done.wait (%p1608_p5), [#allocation9], 1024   ;;  %p1609_p10 = pmov %p1608_p5 }
  0x68   : > { %v1313_v0 = vmov 0   ;;  %v1081_v1 = vld [vmem:[#allocation5 + $0x34] ss:$8 sps:$4 sm:$0xff]   ;;  %v1083_v2 = vld [vmem:[#allocation5 + $0x30] ss:$8 sps:$4 sm:$0xff]   ;;  %v1097_v14 = vld [vmem:[#allocation7 + $0x68] sm:$0xff]   ;;  %v357_v33 = vlaneseq }
  0x69   : > { %1284 = vsyncadd (%p1609_p10), [#allocation9], 4294966272  ;;  %443 = vmatprep.mubr.bf16.mxu0 %v1313_v0  ;;  %419 = vmatprep.subr.bf16.mxu0 %v1081_v1  ;;  %v1084_v3 = vld [vmem:[#allocation5 + $0x24] ss:$8 sps:$4 sm:$0xff]   ;;  %v1086_v4 = vld [vmem:[#allocation5 + $0x20] ss:$8 sps:$4 sm:$0xff]  }
  0x6a   : > { %420 = vmatpush1.bf16.msra.mxu0 %v1083_v2  ;;  %v1087_v5 = vld [vmem:[#allocation5 + $0x14] ss:$8 sps:$4 sm:$0xff]   ;;  %v1089_v6 = vld [vmem:[#allocation5 + $0x10] ss:$8 sps:$4 sm:$0xff]   ;;  %v1090_v7 = vld [vmem:[#allocation5 + $0x4] ss:$8 sps:$4 sm:$0xff]  }
  0x6b   : > { %421 = vmatprep.subr.bf16.mxu0 %v1084_v3  ;;  %v1093_v8 = vld [vmem:[#allocation7 + $0x78] sm:$0xff]   ;;  %v1095_v10 = vld [vmem:[#allocation7 + $0x70] sm:$0xff]   ;;  %v1092_v11 = vld [vmem:[#allocation5] ss:$8 sps:$4 sm:$0xff]   ;;  %vm407_vm0 = vcmask 523264   ;;  %v1314_v29 = vmov 0.0  }
  0x6c   : > { %v1094_v9 = vld [vmem:[#allocation7 + $0x38] sm:$0xff]   ;;  %944 = vmatprep.subr.bf16.mxu1 %v1093_v8  ;;  %v344_v12 = vld [vmem:[%s1505_s19] sm:$0xff]  ;;  %v1098_v16 = vld [vmem:[#allocation7 + $0x28] sm:$0xff]   ;;  %v358_v34 = vshrl.u32 %v357_v33, 7  ;;  %vm1315_vm1 = vmmov 0   ;;  %s943_s22 = sshll.u32 %s1380_s28, 8 }
  0x6d   : > { %945 = vmatpush3.bf16.msra.mxu1 %v1094_v9  ;;  %v1096_v13 = vld [vmem:[#allocation7 + $0x30] sm:$0xff]   ;;  %v345_v15 = vld [vmem:[%s1505_s19 + $0x8] sm:$0xff]  ;;  %v1099_v18 = vld [vmem:[#allocation7 + $0x60] sm:$0xff]   ;;  %s340_s29 = scalar_lea.vmem [#allocation10], %s897_s1  ;;  %s1536_s15 = scalar_lea.hbm %s1587_s7, %s943_s22 }
  0x6e   : > { %422 = vmatpush1.bf16.msra.mxu0 %v1086_v4  ;;  %946 = vmatprep.subr.bf16.mxu1 %v1095_v10  ;;  %v346_v17 = vpack.c.bf16 %v345_v15, %v344_v12  ;;  %v1100_v19 = vld [vmem:[#allocation7 + $0x20] sm:$0xff]   ;;  %v1101_v20 = vld [vmem:[#allocation7 + $0x58] sm:$0xff]   ;;  %v1103_v22 = vld [vmem:[#allocation7 + $0x50] sm:$0xff]   ;;  %v363_v35 = vsub.s32 1, %v358_v34  ;;  %v359_v36 = vsub.s32 0, %v358_v34  ;;  %s785_s10 = sshll.u32 %s340_s29, 4  ;;  %s1538_s10 = int_to_ptr.vmem [resolvable:$true] %s785_s10 }
  0x6f   : > { %423 = vmatprep.subr.bf16.mxu0 %v1087_v5  ;;  %v1102_v21 = vld [vmem:[#allocation7 + $0x18] sm:$0xff]   ;;  %v1104_v23 = vld [vmem:[#allocation7 + $0x10] sm:$0xff]   ;;  %v1105_v24 = vld [vmem:[#allocation7 + $0x48] sm:$0xff]   ;;  %s772_s19 = scalar_lea.sflag [#allocation4], %s1499_s17  ;;  %s1231_s30 = scalar_lea.vmem %s1538_s10, 256 }
  0x70   : > { %v1106_v25 = vld [vmem:[#allocation7 + $0x8] sm:$0xff]   ;;  %v1107_v26 = vld [vmem:[#allocation7 + $0x40] sm:$0xff]   ;;  %v1109_v28 = vld [vmem:[#allocation8 + $0x38] sm:$0xff]   ;;  %p1232_p7 = scmp.ne.s32.totalorder %s1538_s10, %s1231_s30  ;;  %p1610_p11 = scmp.ne.s32.totalorder %s1600_s23, 0 }
  0x71   : > { %947 = vmatpush3.bf16.msra.mxu1 %v1096_v13  ;;  %v1108_v27 = vld [vmem:[#allocation7] sm:$0xff]   ;;  %v1110_v30 = vld [vmem:[#allocation8 + $0x30] sm:$0xff]   ;;  %v1111_v31 = vld [vmem:[#allocation8 + $0x28] sm:$0xff]   ;;  %s1316_s28 = smov [#allocation10]  }
  0x72   : > { %424 = vmatpush1.bf16.msra.mxu0 %v1089_v6  ;;  %948 = vmatprep.subr.bf16.mxu1 %v1097_v14  ;;  %v1112_v32 = vld [vmem:[#allocation8 + $0x20] sm:$0xff]   ;;  %v1113_v54 = vld [vmem:[#allocation8 + $0x18] sm:$0xff]   ;;  %v1114_v55 = vld [vmem:[#allocation8 + $0x10] sm:$0xff]   ;;  %p1233_p12 = pnand %p1232_p7, %p1610_p11  ;;  %s1235_s1 = sshll.u32 %s1316_s28, 4  ;;  %s1236_s1 = int_to_ptr.vmem [resolvable:$false] %s1235_s1 }
  0x73   : > { %425 = vmatprep.subr.bf16.mxu0 %v1090_v7  ;;  %v355_v37 = vld [vmem:[%s1582_s2] sm:$0x3]  ;;  %v1115_v56 = vld [vmem:[#allocation8 + $0x8] sm:$0xff]   ;;  %s1237_s9 = scalar_lea.vmem %s1236_s1, 512  ;;  %p1238_p3 = scmp.lt.s32.totalorder %s1538_s10, %s1236_s1 }
  0x74   : > { %v364_v39 = vrot.slane %v355_v37, %v363_v35  ;;  %v360_v40 = vrot.slane %v355_v37, %v359_v36  ;;  %v1116_v57 = vld [vmem:[#allocation8] sm:$0xff]   ;;  %p1234_p13 = pneg %p1233_p12  ;;  %p1239_p0 = scmp.lt.s32.totalorder %s1237_s9, %s1231_s30 }
  0x75   : > { %949 = vmatpush3.bf16.msra.mxu1 %v1098_v16  ;;  %v911_v61 = vld [vmem:[%s1584_s4] ss:$0 sm:$0xff] }
  0x76   : > { %426 = vmatpush1.bf16.msra.mxu0 %v1092_v11  ;;  %950 = vmatprep.subr.bf16.mxu1 %v1099_v18  ;;  %v928_v6 = vld [vmem:[%s1586_s6] ss:$0 sm:$0xff]  ;;  %p1240_p2 = por %p1239_p0, %p1238_p3 }
  0x77   : > { %975 = vmatprep.subr.bf16.mxu0 %v1314_v29 }
  0x78   : > { %p1241_p9 = pnand %p1240_p2, %p1234_p13 }
  0x79   : > { %910 = vmatmul.mubr.msk.bf16.vlgmr.msra.gmra.mxu0 %vm407_vm0, %v346_v17  ;;  %951 = vmatpush3.bf16.msra.mxu1 %v1100_v19 }
  0x7a   : > { %952 = vmatprep.subr.bf16.mxu1 %v1101_v20  ;;  %976 = vmatpush3.bf16.msra.mxu0 %v1109_v28 }
  0x7b   : > { %977 = vmatprep.subr.bf16.mxu0 %v1314_v29  ;;  %991 = vmatprep.mubr.msk.bf16.mxu0 %vm1315_vm1, %v1314_v29 }
  0x7d   : > { %953 = vmatpush3.bf16.msra.mxu1 %v1102_v21 }
  0x7e   : > { %954 = vmatprep.subr.bf16.mxu1 %v1103_v22  ;;  %978 = vmatpush3.bf16.msra.mxu0 %v1110_v30 }
  0x7f   : > { %979 = vmatprep.subr.bf16.mxu0 %v1314_v29 }
  0x81   : > { %955 = vmatpush3.bf16.msra.mxu1 %v1104_v23 }
  0x82   : > { %956 = vmatprep.subr.bf16.mxu1 %v1105_v24  ;;  %980 = vmatpush3.bf16.msra.mxu0 %v1111_v31 }
  0x83   : > { %981 = vmatprep.subr.bf16.mxu0 %v1314_v29 }
  0x85   : > { %957 = vmatpush3.bf16.msra.mxu1 %v1106_v25 }
  0x86   : > { %958 = vmatprep.subr.bf16.mxu1 %v1107_v26  ;;  %982 = vmatpush3.bf16.msra.mxu0 %v1112_v32 }
  0x87   : > { %983 = vmatprep.subr.bf16.mxu0 %v1314_v29 }
  0x89   : > { %959 = vmatpush3.bf16.msra.mxu1 %v1108_v27 }
  0x8a   : > { %984 = vmatpush3.bf16.msra.mxu0 %v1113_v54 }
  0x8b   : > { %985 = vmatprep.subr.bf16.mxu0 %v1314_v29 }
  0x8e   : > { %986 = vmatpush3.bf16.msra.mxu0 %v1114_v55 }
  0x8f   : > { %987 = vmatprep.subr.bf16.mxu0 %v1314_v29 }
  0x92   : > { %988 = vmatpush3.bf16.msra.mxu0 %v1115_v56 }
  0x93   : > { %989 = vmatprep.subr.bf16.mxu0 %v1314_v29 }
  0x96   : > { %990 = vmatpush3.bf16.msra.mxu0 %v1116_v57 }
 0x139   : > { %v445_v38 = vpop.f32.mrf.mxu0 }
 0x13a   : > { %v446_v45 = vadd.f32 %v445_v38, %v360_v40 }
 0x13b   : > { %v447_v41 = vpop.f32.mrf.mxu0 }
 0x13c   : > { %v448_v43 = vadd.f32 %v447_v41, %v364_v39  ;;  %v454_v51 = vmax.f32 %v446_v45, 0.0 }
 0x13d   : > { %v449_v42 = vpop.f32.mrf.mxu0 }
 0x13e   : > { %v450_v44 = vadd.f32 %v449_v42, %v360_v40  ;;  %v455_v49 = vmax.f32 %v448_v43, 0.0 }
 0x13f   : > { %v451_v46 = vpop.f32.mrf.mxu0 }
 0x140   : > { %v452_v47 = vadd.f32 %v451_v46, %v364_v39  ;;  %v456_v48 = vmax.f32 %v450_v44, 0.0 }
 0x142   : > { %v457_v50 = vmax.f32 %v452_v47, 0.0  ;;  %v458_v53 = vpack.c.bf16 %v456_v48, %v454_v51 }
 0x144   : > { %v459_v52 = vpack.c.bf16 %v457_v50, %v455_v49 }
 0x146   : > { %627 = vmatprep.mubr.bf16.mxu1 %v459_v52 }
 0x147   : > { %628 = vmatmul.mubr.bf16.vlgmr.msra.gmra.mxu1 %v458_v53 }
 0x207   : > { %v960_v58 = vpop.f32.mrf.mxu1 }
 0x209   : > { %v961_v59 = vpop.f32.mrf.mxu1 }
 0x20a   : > { %v962_v60 = vadd.f32 %v961_v59, %v960_v58 }
 0x20b   : > { %v963_v62 = vpop.f32.mrf.mxu1 }
 0x20c   : > { %v630_v0 = vadd.f32 %v962_v60, %v911_v61 }
 0x20d   : > { %v964_v63 = vpop.f32.mrf.mxu1 }
 0x20e   : > { %v965_v1 = vadd.f32 %v964_v63, %v963_v62  ;;  %v636_v3 = vmax.f32 %v630_v0, 0.0 }
 0x210   : > { %v633_v2 = vadd.f32 %v965_v1, %v911_v61 }
 0x212   : > { %v637_v4 = vmax.f32 %v633_v2, 0.0 }
 0x214   : > { %v638_v5 = vpack.c.bf16 %v637_v4, %v636_v3 }
 0x216   : > { %992 = vmatmul.mubr.bf16.vlgmr.msra.gmra.mxu0 %v638_v5 }
 0x2d6   : > { %v744_v7 = vpop.f32.mrf.mxu0 }
 0x2d7   : > { %v745_v8 = vadd.f32 %v928_v6, %v744_v7 }
 0x2d8   : > { %v993_v9 = vpop.f32.mrf.mxu0 }
 0x2d9   : > { %751 = vmax.xlane.f32.xlu0 %v745_v8 }
 0x2da   : > { %v747_v10 = vpop.f32.mrf.mxu0 }
 0x2db   : > { %v748_v11 = vadd.f32 %v928_v6, %v747_v10 }
 0x2dc   : > { %v994_v12 = vpop.f32.mrf.mxu0 }
 0x2dd   : > { %753 = vmax.xlane.f32.xlu0 %v748_v11 }
 0x362   : > { %v752_v13 = vpop.xlane.xlu0 %751 }
 0x363   : > { %v755_v14 = vsub.f32 %v745_v8, %v752_v13 }
 0x365   : > { %v757_v15 = vmul.f32 1.442695, %v755_v14 }
 0x366   : > { %v754_v16 = vpop.xlane.xlu0 %753 }
 0x367   : > { %1117 = vpow2.f32 %v757_v15  ;;  %v756_v17 = vsub.f32 %v748_v11, %v754_v16 }
 0x369   : > { %v759_v18 = vmul.f32 1.442695, %v756_v17 }
 0x36b   : > { %1119 = vpow2.f32 %v759_v18 }
 0x374   : > { %v1118_v19 = vpop.eup %1117 }
 0x375   : > { %761 = vadd.xlane.f32.xlu1 %v1118_v19 }
 0x378   : > { %v1120_v20 = vpop.eup %1119 }
 0x379   : > { %763 = vadd.xlane.f32.xlu1 %v1120_v20 }
 0x3fe   : > { %v762_v21 = vpop.xlane.xlu1 %761 }
 0x3ff   : > { %1121 = vrcp.f32 %v762_v21 }
 0x402   : > { %v764_v22 = vpop.xlane.xlu1 %763 }
 0x403   : > { %1123 = vrcp.f32 %v764_v22 }
 0x40c   : > { %v1122_v23 = vpop.eup %1121 }
 0x40d   : > { %v766_v24 = vmul.f32 %v1122_v23, %v1118_v19 }
 0x40f   : > { %769 = vst [vmem:[%s340_s29] sm:$0xff] %v766_v24 }
 0x410   : > { %v1124_v25 = vpop.eup %1123 }
 0x411   : > { %v768_v26 = vmul.f32 %v1124_v25, %v1120_v20 }
 0x413   : > { %770 = vst [vmem:[%s340_s29 + $0x8] sm:$0xff] %v768_v26 }
 0x414   : > { %1244 = shalt.err (!%p1241_p9)
}
 0x415   : > { %s1245_s21 = scalar_lea.hbm %s1536_s15, 256  ;;  %s1249_s14 = scalar_lea.hbm %s1587_s7, 1024 }
 0x416   : > { %p1246_p1 = scmp.ne.s32.totalorder %s1536_s15, %s1245_s21  ;;  %p1250_p8 = scmp.lt.s32.totalorder %s1536_s15, %s1587_s7 }
 0x417   : > { %p1251_p5 = scmp.lt.s32.totalorder %s1249_s14, %s1245_s21 }
 0x418   : > { %p1247_p4 = pnand %p1246_p1, %p1610_p11 }
 0x419   : > { %p1252_p10 = por %p1251_p5, %p1250_p8 }
 0x41a   : > { %p1248_p6 = pneg %p1247_p4 }
 0x41c   : > { %p1253_p7 = pnand %p1252_p10, %p1248_p6 }
 0x41e   : > { %1256 = shalt.err (!%p1253_p7)
}
 0x41f   : > { %s1317_s16 = smov 128   ;;  %s1318_s18 = smov 8  }
 0x420   : > { %1009 = dma.vmem_to_hbm [thread:$0]  (%p1610_p11), %s1538_s10, 256, %s1536_s15, %s772_s19, %s1317_s16, %s1317_s16, %s1318_s18  }
 0x421 PF: > { %p1036_p12 = scmp.ge.s32.totalorder %s1303_s27, 2  ;;  %s800_s30 = sand.u32 1, %s1291_s24  }
 0x422   : > { %p1611_p13 = scmp.ne.s32.totalorder %s1596_s8, 0  ;;  %s801_s28 = scalar_lea.sflag [#allocation4], %s800_s30 }
 0x424   : > { %p1026_p3 = pnand %p1036_p12, %p1611_p13 }
 0x426   : > { %p1027_p0 = pneg %p1026_p3 }
 0x428   : > { %1286 = dma.done.wait (%p1027_p0), %s801_s28, 256  }
 0x429   : > { %1288 = vsyncadd (%p1027_p0), %s801_s28, 4294967040  ;;  %p22_p2 = scmp.ge.s32.totalorder %s1433_s13, 6   ;;  %s1612_s24 = smov %s1295_s25 }
 0x42a   : > { %s1613_s25 = smov %s1299_s26  ;;  %s1614_s26 = smov %s1451_s12 }
 0x42b   : > { %s1615_s27 = smov %s1433_s13  ;;  %24 = sbr.rel (!%p22_p2) target bundleno = 9 (0x9), region = 105 }
 0x430   :  { %806 = vsyncpa [#allocation3], 1 }
 0x431   :  { %808 = vsyncpa [#allocation3 + $0x1], 1 }
 0x432   :  { %809 = vsyncpa [#allocation6], 1 }
 0x433   :  { %810 = vsyncpa [#allocation9], 1 }
 0x434   :  { %811 = vsyncpa [#allocation4], 1 }
 0x435   :  { %813 = vsyncpa [#allocation4 + $0x1], 1 }

</bundles_post_ra>
